<compile_context>
chip_gen: v5e
topology: v5e:2x2
jax: 0.10.0
libtpu: 0.0.40
codegen_flags: <defaults>
</compile_context>

<pallas_src>
import jax
import jax.numpy as jnp
from jax.experimental import pallas as pl
from jax.experimental.pallas import tpu as pltpu

_LANE = 128


def _round_up(n, m):
    return ((n + m - 1) // m) * m


def _make_mlp_kernel(n_linear):
    """Builds a kernel taking (x_ref, w0, b0, w1, b1, ..., out_ref)."""

    def kernel(*refs):
        x_ref = refs[0]
        out_ref = refs[-1]
        h = x_ref[...]  # bf16 activations feed the MXU directly
        for i in range(n_linear):
            w = refs[1 + 2 * i][...]  # bf16 weights
            b = refs[2 + 2 * i][...]  # f32 bias, broadcast over batch rows
            acc = jnp.dot(h, w, preferred_element_type=jnp.float32) + b
            if i < n_linear - 1:
                # tanh on the EUP in f32, repack to bf16 for the next MXU pass.
                h = jnp.tanh(acc).astype(jnp.bfloat16)
            else:
                h = acc  # final layer stays f32
        out_ref[...] = h.astype(out_ref.dtype)

    return kernel


def one_class_forward(x, weights, biases, *, block_b=None):
    """Runs the OneClass MLP forward pass with a single fused Pallas kernel.

    x:        [B, input_dim] float32
    weights:  list of [d_in, d_out] float32 (already transposed vs. PyTorch)
    biases:   list of [1, d_out]   float32
    """
    B, D = x.shape
    n_linear = len(weights)
    out_dim = weights[-1].shape[1]

    if block_b is None:
        # Whole batch in one grid step for small B (amortizes the ~0.35 us/step grid cost);
        # 256-row tiles otherwise (fills the v6e/v7x 256-wide MXU M dim, multiple of 128 for
        # v5e, and keeps the grid long enough that v7x's two TensorCores both get work).
        block_b = _round_up(B, 8) if B <= 1024 else 256
    B_pad = _round_up(B, block_b)

    # Lane-pad the final layer so the output store is lane-dense (no masked partial stores).
    out_pad = _round_up(out_dim, _LANE)

    x_p = x if B_pad == B else jnp.pad(x, ((0, B_pad - B), (0, 0)))
    x_bf16 = x_p.astype(jnp.bfloat16)

    w_list, b_list = [], []
    for i, (w, b) in enumerate(zip(weights, biases)):
        if i == n_linear - 1 and out_pad != out_dim:
            w = jnp.pad(w, ((0, 0), (0, out_pad - out_dim)))
            b = jnp.pad(b, ((0, 0), (0, out_pad - out_dim)))
        w_list.append(w.astype(jnp.bfloat16))
        b_list.append(b.astype(jnp.float32))

    kernel = _make_mlp_kernel(n_linear)

    # x tiled along batch; all weights/biases are tiny and kept fully VMEM-resident
    # at every grid step (index_map -> block (0, 0)).
    in_specs = [pl.BlockSpec((block_b, D), lambda i: (i, 0))]
    operands = [x_bf16]
    for w, b in zip(w_list, b_list):
        in_specs.append(pl.BlockSpec(w.shape, lambda i: (0, 0)))
        in_specs.append(pl.BlockSpec(b.shape, lambda i: (0, 0)))
        operands.append(w)
        operands.append(b)

    out_spec = pl.BlockSpec((block_b, out_pad), lambda i: (i, 0))

    # Advisory cost so XLA doesn't pessimistically serialize this small custom call.
    flops = 2 * B_pad * sum(w.shape[0] * w.shape[1] for w in w_list)
    transcendentals = B_pad * sum(w.shape[1] for w in w_list[:-1])
    bytes_accessed = (
        x_bf16.size * 2
        + sum(w.size * 2 for w in w_list)
        + sum(b.size * 4 for b in b_list)
        + B_pad * out_pad * 4
    )

    out = pl.pallas_call(
        kernel,
        out_shape=jax.ShapeDtypeStruct((B_pad, out_pad), jnp.float32),
        grid=(B_pad // block_b,),
        in_specs=in_specs,
        out_specs=out_spec,
        compiler_params=pltpu.CompilerParams(
            dimension_semantics=("parallel",)
        ),
        cost_estimate=pl.CostEstimate(
            flops=flops,
            transcendentals=transcendentals,
            bytes_accessed=bytes_accessed,
        ),
    )(*operands)

    return out[:B, :out_dim]


def init_one_class_params(key, input_dim, num_hidden, output_dim, num_layers):
    """Deterministic init mimicking PyTorch Linear default U(-1/sqrt(fan_in), ...)."""
    dims = [input_dim] + [num_hidden] * num_layers + [output_dim]
    weights, biases = [], []
    for i in range(len(dims) - 1):
        d_in, d_out = dims[i], dims[i + 1]
        key, kw, kb = jax.random.split(key, 3)
        bound = 1.0 / jnp.sqrt(d_in)
        # stored as [d_in, d_out]  (== PyTorch weight.T)
        w = jax.random.uniform(kw, (d_in, d_out), jnp.float32, -bound, bound)
        b = jax.random.uniform(kb, (1, d_out), jnp.float32, -bound, bound)
        weights.append(w)
        biases.append(b)
    return weights, biases


def one_class_reference(x, weights, biases):
    """Plain-JAX f32 reference of the same forward (for verification)."""
    h = x
    n = len(weights)
    for i, (w, b) in enumerate(zip(weights, biases)):
        h = h @ w + b
        if i < n - 1:
            h = jnp.tanh(h)
    return h


if __name__ == "__main__":
    # OneClass(input_dim=32, num_hidden=64, output_dim=4, num_layers=3,
    #          dropout_active=False, dropout_prob=0.0)
    input_dim, num_hidden, output_dim, num_layers = 32, 64, 4, 3
    B = 16

    key = jax.random.PRNGKey(0)
    key, kx = jax.random.split(key)
    x = jax.random.normal(kx, (B, input_dim), jnp.float32)

    weights, biases = init_one_class_params(
        key, input_dim, num_hidden, output_dim, num_layers
    )

    out = one_class_forward(x, weights, biases)
    out = jax.block_until_ready(out)

    ref = one_class_reference(x, weights, biases)
    assert out.shape == (B, output_dim)
    # bf16 matmul inputs (f32 accumulate) -> loose tolerance vs. pure-f32 reference.
    assert jnp.allclose(out, ref, atol=2e-2, rtol=2e-2), "mismatch vs reference"

    print("KERNEL_OK")
</pallas_src>

<mosaic_0001>
module attributes {stable_mosaic.version = 11 : i64} {
  func.func @kernel(%arg0: i32, %arg1: memref<16x32xbf16, #tpu.memory_space<vmem>>, %arg2: memref<32x64xbf16, #tpu.memory_space<vmem>>, %arg3: memref<1x64xf32, #tpu.memory_space<vmem>>, %arg4: memref<64x64xbf16, #tpu.memory_space<vmem>>, %arg5: memref<1x64xf32, #tpu.memory_space<vmem>>, %arg6: memref<64x64xbf16, #tpu.memory_space<vmem>>, %arg7: memref<1x64xf32, #tpu.memory_space<vmem>>, %arg8: memref<64x128xbf16, #tpu.memory_space<vmem>>, %arg9: memref<1x128xf32, #tpu.memory_space<vmem>>, %arg10: memref<16x128xf32, #tpu.memory_space<vmem>>) attributes {dimension_semantics = [#tpu.dimension_semantics<parallel>], iteration_bounds = array<i64: 1>, scalar_prefetch = 0 : i64, scratch_operands = 0 : i64, tpu.core_type = #tpu.core_type<tc>, window_params = [{transform_indices = @transform_0, window_bounds = array<i64: 16, 32>}, {pipeline_mode = #tpu.pipeline_mode<synchronous>, transform_indices = @transform_1, window_bounds = array<i64: 32, 64>}, {pipeline_mode = #tpu.pipeline_mode<synchronous>, transform_indices = @transform_2, window_bounds = array<i64: 1, 64>}, {pipeline_mode = #tpu.pipeline_mode<synchronous>, transform_indices = @transform_3, window_bounds = array<i64: 64, 64>}, {pipeline_mode = #tpu.pipeline_mode<synchronous>, transform_indices = @transform_4, window_bounds = array<i64: 1, 64>}, {pipeline_mode = #tpu.pipeline_mode<synchronous>, transform_indices = @transform_5, window_bounds = array<i64: 64, 64>}, {pipeline_mode = #tpu.pipeline_mode<synchronous>, transform_indices = @transform_6, window_bounds = array<i64: 1, 64>}, {pipeline_mode = #tpu.pipeline_mode<synchronous>, transform_indices = @transform_7, window_bounds = array<i64: 64, 128>}, {pipeline_mode = #tpu.pipeline_mode<synchronous>, transform_indices = @transform_8, window_bounds = array<i64: 1, 128>}, {transform_indices = @transform_9, window_bounds = array<i64: 16, 128>}]} {
    %c0 = arith.constant 0 : index
    %c0_0 = arith.constant 0 : index
    %0 = vector.load %arg1[%c0, %c0_0] : memref<16x32xbf16, #tpu.memory_space<vmem>>, vector<16x32xbf16>
    %c0_1 = arith.constant 0 : index
    %c0_2 = arith.constant 0 : index
    %1 = vector.load %arg2[%c0_1, %c0_2] : memref<32x64xbf16, #tpu.memory_space<vmem>>, vector<32x64xbf16>
    %c0_3 = arith.constant 0 : index
    %c0_4 = arith.constant 0 : index
    %2 = vector.load %arg3[%c0_3, %c0_4] : memref<1x64xf32, #tpu.memory_space<vmem>>, vector<1x64xf32>
    %cst = arith.constant dense<0.000000e+00> : vector<16x64xf32>
    %3 = tpu.matmul %0, %1, %cst {dimension_numbers = #tpu.dot_dimension_numbers<[1], [0], [0], [1], [0, 0, 1, 1], [], []>} : vector<16x32xbf16>, vector<32x64xbf16>, vector<16x64xf32> -> vector<16x64xf32>
    %4 = vector.broadcast %2 : vector<1x64xf32> to vector<16x64xf32>
    %5 = arith.addf %3, %4 : vector<16x64xf32>
    %6 = math.tanh %5 : vector<16x64xf32>
    %7 = arith.truncf %6 : vector<16x64xf32> to vector<16x64xbf16>
    %c0_5 = arith.constant 0 : index
    %c0_6 = arith.constant 0 : index
    %8 = vector.load %arg4[%c0_5, %c0_6] : memref<64x64xbf16, #tpu.memory_space<vmem>>, vector<64x64xbf16>
    %c0_7 = arith.constant 0 : index
    %c0_8 = arith.constant 0 : index
    %9 = vector.load %arg5[%c0_7, %c0_8] : memref<1x64xf32, #tpu.memory_space<vmem>>, vector<1x64xf32>
    %cst_9 = arith.constant dense<0.000000e+00> : vector<16x64xf32>
    %10 = tpu.matmul %7, %8, %cst_9 {dimension_numbers = #tpu.dot_dimension_numbers<[1], [0], [0], [1], [0, 0, 1, 1], [], []>} : vector<16x64xbf16>, vector<64x64xbf16>, vector<16x64xf32> -> vector<16x64xf32>
    %11 = vector.broadcast %9 : vector<1x64xf32> to vector<16x64xf32>
    %12 = arith.addf %10, %11 : vector<16x64xf32>
    %13 = math.tanh %12 : vector<16x64xf32>
    %14 = arith.truncf %13 : vector<16x64xf32> to vector<16x64xbf16>
    %c0_10 = arith.constant 0 : index
    %c0_11 = arith.constant 0 : index
    %15 = vector.load %arg6[%c0_10, %c0_11] : memref<64x64xbf16, #tpu.memory_space<vmem>>, vector<64x64xbf16>
    %c0_12 = arith.constant 0 : index
    %c0_13 = arith.constant 0 : index
    %16 = vector.load %arg7[%c0_12, %c0_13] : memref<1x64xf32, #tpu.memory_space<vmem>>, vector<1x64xf32>
    %cst_14 = arith.constant dense<0.000000e+00> : vector<16x64xf32>
    %17 = tpu.matmul %14, %15, %cst_14 {dimension_numbers = #tpu.dot_dimension_numbers<[1], [0], [0], [1], [0, 0, 1, 1], [], []>} : vector<16x64xbf16>, vector<64x64xbf16>, vector<16x64xf32> -> vector<16x64xf32>
    %18 = vector.broadcast %16 : vector<1x64xf32> to vector<16x64xf32>
    %19 = arith.addf %17, %18 : vector<16x64xf32>
    %20 = math.tanh %19 : vector<16x64xf32>
    %21 = arith.truncf %20 : vector<16x64xf32> to vector<16x64xbf16>
    %c0_15 = arith.constant 0 : index
    %c0_16 = arith.constant 0 : index
    %22 = vector.load %arg8[%c0_15, %c0_16] : memref<64x128xbf16, #tpu.memory_space<vmem>>, vector<64x128xbf16>
    %c0_17 = arith.constant 0 : index
    %c0_18 = arith.constant 0 : index
    %23 = vector.load %arg9[%c0_17, %c0_18] : memref<1x128xf32, #tpu.memory_space<vmem>>, vector<1x128xf32>
    %cst_19 = arith.constant dense<0.000000e+00> : vector<16x128xf32>
    %24 = tpu.matmul %21, %22, %cst_19 {dimension_numbers = #tpu.dot_dimension_numbers<[1], [0], [0], [1], [0, 0, 1, 1], [], []>} : vector<16x64xbf16>, vector<64x128xbf16>, vector<16x128xf32> -> vector<16x128xf32>
    %25 = vector.broadcast %23 : vector<1x128xf32> to vector<16x128xf32>
    %26 = arith.addf %24, %25 : vector<16x128xf32>
    %c0_20 = arith.constant 0 : index
    %c0_21 = arith.constant 0 : index
    %27 = vector.load %arg10[%c0_20, %c0_21] : memref<16x128xf32, #tpu.memory_space<vmem>>, vector<16x128xf32>
    tpu.vector_store %arg10[%c0_20, %c0_21], %26 {strides = array<i32>} : memref<16x128xf32, #tpu.memory_space<vmem>>, vector<16x128xf32>,
    return
  }
  func.func @transform_0(%arg0: i32) -> (i32, i32) {
    %c0_i32 = arith.constant 0 : i32
    %c0_i32_0 = arith.constant 0 : i32
    return %arg0, %c0_i32 : i32, i32
  }
  func.func @transform_1(%arg0: i32) -> (i32, i32) {
    %c0_i32 = arith.constant 0 : i32
    %c0_i32_0 = arith.constant 0 : i32
    %c0_i32_1 = arith.constant 0 : i32
    return %c0_i32, %c0_i32_0 : i32, i32
  }
  func.func @transform_2(%arg0: i32) -> (i32, i32) {
    %c0_i32 = arith.constant 0 : i32
    %c0_i32_0 = arith.constant 0 : i32
    %c0_i32_1 = arith.constant 0 : i32
    return %c0_i32, %c0_i32_0 : i32, i32
  }
  func.func @transform_3(%arg0: i32) -> (i32, i32) {
    %c0_i32 = arith.constant 0 : i32
    %c0_i32_0 = arith.constant 0 : i32
    %c0_i32_1 = arith.constant 0 : i32
    return %c0_i32, %c0_i32_0 : i32, i32
  }
  func.func @transform_4(%arg0: i32) -> (i32, i32) {
    %c0_i32 = arith.constant 0 : i32
    %c0_i32_0 = arith.constant 0 : i32
    %c0_i32_1 = arith.constant 0 : i32
    return %c0_i32, %c0_i32_0 : i32, i32
  }
  func.func @transform_5(%arg0: i32) -> (i32, i32) {
    %c0_i32 = arith.constant 0 : i32
    %c0_i32_0 = arith.constant 0 : i32
    %c0_i32_1 = arith.constant 0 : i32
    return %c0_i32, %c0_i32_0 : i32, i32
  }
  func.func @transform_6(%arg0: i32) -> (i32, i32) {
    %c0_i32 = arith.constant 0 : i32
    %c0_i32_0 = arith.constant 0 : i32
    %c0_i32_1 = arith.constant 0 : i32
    return %c0_i32, %c0_i32_0 : i32, i32
  }
  func.func @transform_7(%arg0: i32) -> (i32, i32) {
    %c0_i32 = arith.constant 0 : i32
    %c0_i32_0 = arith.constant 0 : i32
    %c0_i32_1 = arith.constant 0 : i32
    return %c0_i32, %c0_i32_0 : i32, i32
  }
  func.func @transform_8(%arg0: i32) -> (i32, i32) {
    %c0_i32 = arith.constant 0 : i32
    %c0_i32_0 = arith.constant 0 : i32
    %c0_i32_1 = arith.constant 0 : i32
    return %c0_i32, %c0_i32_0 : i32, i32
  }
  func.func @transform_9(%arg0: i32) -> (i32, i32) {
    %c0_i32 = arith.constant 0 : i32
    %c0_i32_0 = arith.constant 0 : i32
    return %arg0, %c0_i32 : i32, i32
  }
}

</mosaic_0001>

<bundles_post_ra>
// kernel: tpu_custom_call.1
= control target key start
LH: loop header
LB: loop body
LE: loop exit
PB: predicated region body
PF: predicated region fallthrough
CT: control target
= control target key end

     0   :  { %14 = vsyncpa [#allocation3], 0  ;;  %s699_s0 = inlined_call_operand.hbm [shape: bf16[16,32], index: 0, kind: input, shape index: {}]   ;;  %s700_s1 = inlined_call_operand.hbm [shape: bf16[32,64], index: 1, kind: input, shape index: {}]   ;;  %s701_s2 = inlined_call_operand.vmem [shape: f32[1,64], index: 2, kind: input, shape index: {}]   ;;  %s702_s3 = inlined_call_operand.hbm [shape: bf16[64,64], index: 3, kind: input, shape index: {}]   ;;  %s703_s4 = inlined_call_operand.vmem [shape: f32[1,64], index: 4, kind: input, shape index: {}]   ;;  %s704_s5 = inlined_call_operand.hbm [shape: bf16[64,64], index: 5, kind: input, shape index: {}]   ;;  %s705_s6 = inlined_call_operand.vmem [shape: f32[1,64], index: 6, kind: input, shape index: {}]   ;;  %s706_s7 = inlined_call_operand.hbm [shape: bf16[64,128], index: 7, kind: input, shape index: {}]   ;;  %s707_s8 = inlined_call_operand.vmem [shape: f32[1,128], index: 8, kind: input, shape index: {}]   ;;  %s708_s9 = inlined_call_operand.hbm [shape: f32[16,128], index: 9, kind: output, shape index: {}]  }
   0x1   :  { %15 = vsyncpa [#allocation6], 0 }
   0x2   :  { %16 = vsyncpa [#allocation9], 0 }
   0x3   :  { %17 = vsyncpa [#allocation4], 0  ;;  %s35_s11 = sshll.u32 %s700_s1, 4  ;;  %s606_s12 = smov [#allocation5]   ;;  %s36_s11 = int_to_ptr.hbm [resolvable:$true] %s35_s11 }
   0x4   :  { %s37_s13 = sshll.u32 %s606_s12, 4  ;;  %s65_s16 = sshll.u32 %s704_s5, 4  ;;  %s38_s13 = int_to_ptr.vmem [resolvable:$true] %s37_s13  ;;  %s66_s16 = int_to_ptr.hbm [resolvable:$true] %s65_s16 }
   0x5   :  { %s607_s17 = smov 64   ;;  %s608_s18 = smov 4  }
   0x6   :  { %43 = dma.hbm_to_vmem [thread:$0]  %s36_s11, 256, %s38_s13, [#allocation6], %s607_s17, %s607_s17, %s608_s18  }
   0x7   :  { %s609_s19 = smov [#allocation8]   ;;  %s22_s23 = sshll.u32 %s699_s0, 4  ;;  %s23_s23 = int_to_ptr.hbm [resolvable:$true] %s22_s23 }
   0x8   :  { %s67_s20 = sshll.u32 %s609_s19, 4  ;;  %s50_s25 = sshll.u32 %s702_s3, 4  ;;  %s68_s20 = int_to_ptr.vmem [resolvable:$true] %s67_s20  ;;  %s51_s25 = int_to_ptr.hbm [resolvable:$true] %s50_s25 }
   0x9   :  { %73 = dma.hbm_to_vmem [thread:$0]  %s66_s16, 512, %s68_s20, [#allocation9], %s607_s17, %s607_s17, %s608_s18  }
   0xa   :  { %s610_s26 = smov [#allocation2]   ;;  %s611_s5 = smov [#allocation7]  }
   0xb   :  { %s24_s27 = sshll.u32 %s610_s26, 4  ;;  %s52_s28 = sshll.u32 %s611_s5, 4  ;;  %s25_s27 = int_to_ptr.vmem [resolvable:$true] %s24_s27  ;;  %s53_s28 = int_to_ptr.vmem [resolvable:$true] %s52_s28 }
   0xc   :  { %30 = dma.hbm_to_vmem [thread:$0]  %s23_s23, 128, %s25_s27, [#allocation3], %s607_s17, %s607_s17, %s608_s18  }
   0xd   :  { %s80_s10 = sshll.u32 %s706_s7, 4  ;;  %s612_s0 = smov [#allocation10]   ;;  %s81_s10 = int_to_ptr.hbm [resolvable:$true] %s80_s10 }
   0xe   :  { %58 = dma.hbm_to_vmem [thread:$0]  %s51_s25, 512, %s53_s28, [#allocation6], %s607_s17, %s607_s17, %s608_s18  }
   0xf   :  { %s82_s11 = sshll.u32 %s612_s0, 4  ;;  %s83_s11 = int_to_ptr.vmem [resolvable:$true] %s82_s11 }
  0x10   :  { %88 = dma.hbm_to_vmem [thread:$0]  %s81_s10, 512, %s83_s11, [#allocation9], %s607_s17, %s607_s17, %s608_s18  }
  0x11   :  { %598 = dma.done.wait [#allocation3], 128  }
  0x12   :  { %599 = vsyncadd [#allocation3], 4294967168 }
  0x13   :  { %600 = dma.done.wait [#allocation6], 768  }
  0x14   :  { %601 = vsyncadd [#allocation6], 4294966528 }
  0x15   :  { %602 = dma.done.wait [#allocation9], 1024  }
  0x16   :  { %603 = vsyncadd [#allocation9], 4294966272  ;;  %v415_v0 = vld [vmem:[#allocation5 + $0x8] sm:$0xff]  ;;  %v414_v1 = vld [vmem:[#allocation5] sm:$0xff]  ;;  %vm139_vm0 = vcmask 261120   ;;  %vm196_vm1 = vcmask 523264  }
  0x17   :  { %149 = vmatpush.bf16.msra.mxu0 %v415_v0  ;;  %v413_v2 = vld [vmem:[#allocation2] sm:$0xff]  ;;  %v419_v3 = vld [vmem:[#allocation7 + $0x18] sm:$0xff]  ;;  %v418_v4 = vld [vmem:[#allocation7 + $0x10] sm:$0xff]  ;;  %s613_s16 = smov [#allocation11]   ;;  %s334_s19 = sshll.u32 %s708_s9, 4  ;;  %s335_s19 = int_to_ptr.hbm [resolvable:$true] %s334_s19 }
  0x18   :  { %204 = vmatpush.bf16.msra.mxu1 %v419_v3  ;;  %v417_v5 = vld [vmem:[#allocation7 + $0x8] sm:$0xff]  ;;  %v416_v6 = vld [vmem:[#allocation7] sm:$0xff]  ;;  %v423_v15 = vld [vmem:[#allocation8 + $0x18] sm:$0xff]  ;;  %s332_s17 = sshll.u32 %s613_s16, 4  ;;  %s614_s20 = smov 128   ;;  %s333_s17 = int_to_ptr.vmem [resolvable:$true] %s332_s17 }
  0x19   :  { %v438_v8 = vld [vmem:[%s701_s2] ss:$0 sm:$0xff]  ;;  %260 = vmatpush.bf16.msra.mxu2 %v423_v15  ;;  %v422_v16 = vld [vmem:[#allocation8 + $0x10] sm:$0xff]  ;;  %v420_v18 = vld [vmem:[#allocation8] sm:$0xff]  ;;  %s615_s21 = smov 8  }
  0x1a   :  { %v421_v17 = vld [vmem:[#allocation8 + $0x8] sm:$0xff]  ;;  %v427_v27 = vld [vmem:[#allocation10 + $0x18] sm:$0xff]  ;;  %v426_v28 = vld [vmem:[#allocation10 + $0x10] sm:$0xff] }
  0x1b   :  { %150 = vmatpush.bf16.msra.mxu0 %v414_v1  ;;  %v439_v20 = vld [vmem:[%s703_s4] ss:$0 sm:$0xff]  ;;  %316 = vmatpush.bf16.msra.mxu3 %v427_v27  ;;  %v424_v30 = vld [vmem:[#allocation10] sm:$0xff] }
  0x1c   :  { %205 = vmatpush.bf16.msra.mxu1 %v418_v4  ;;  %v425_v29 = vld [vmem:[#allocation10 + $0x8] sm:$0xff] }
  0x1d   :  { %261 = vmatpush.bf16.msra.mxu2 %v422_v16  ;;  %v440_v32 = vld [vmem:[%s705_s6] ss:$0 sm:$0xff] }
  0x1e   :  { %361 = vmatmul.msk.bf16.vlgmr.msra.gmra.mxu0 %vm139_vm0, %v413_v2  ;;  %v441_v39 = vld [vmem:[%s707_s8] ss:$0 sm:$0xff] }
  0x1f   :  { %317 = vmatpush.bf16.msra.mxu3 %v426_v28 }
  0x20   :  { %206 = vmatpush.bf16.msra.mxu1 %v417_v5 }
  0x21   :  { %262 = vmatpush.bf16.msra.mxu2 %v421_v17 }
  0x23   :  { %318 = vmatpush.bf16.msra.mxu3 %v425_v29 }
  0x24   :  { %207 = vmatpush.bf16.msra.mxu1 %v416_v6 }
  0x25   :  { %263 = vmatpush.bf16.msra.mxu2 %v420_v18 }
  0x27   :  { %319 = vmatpush.bf16.msra.mxu3 %v424_v30 }
  0x9b   :  { %v152_v7 = vpop.f32.mrf.mxu0 }
  0x9c   :  { %v153_v9 = vadd.f32 %v438_v8, %v152_v7 }
  0x9e   :  { %442 = vtanh.f32 %v153_v9 }
  0xa3   :  { %v154_v10 = vpop.f32.mrf.mxu0 }
  0xa4   :  { %v155_v11 = vadd.f32 %v438_v8, %v154_v10  ;;  %v443_v12 = vpop.eup %442 }
  0xa6   :  { %444 = vtanh.f32 %v155_v11 }
  0xac   :  { %v445_v13 = vpop.eup %444 }
  0xad   :  { %v159_v14 = vpack.c.bf16 %v445_v13, %v443_v12 }
  0xaf   :  { %378 = vmatmul.msk.bf16.vlgmr.msra.gmra.mxu1 %vm196_vm1, %v159_v14 }
 0x12c   :  { %v209_v19 = vpop.f32.mrf.mxu1 }
 0x12d   :  { %v210_v21 = vadd.f32 %v439_v20, %v209_v19 }
 0x12f   :  { %446 = vtanh.f32 %v210_v21 }
 0x134   :  { %v211_v22 = vpop.f32.mrf.mxu1 }
 0x135   :  { %v212_v23 = vadd.f32 %v439_v20, %v211_v22  ;;  %v447_v24 = vpop.eup %446 }
 0x137   :  { %448 = vtanh.f32 %v212_v23 }
 0x13d   :  { %v449_v25 = vpop.eup %448 }
 0x13e   :  { %v216_v26 = vpack.c.bf16 %v449_v25, %v447_v24 }
 0x140   :  { %395 = vmatmul.msk.bf16.vlgmr.msra.gmra.mxu2 %vm196_vm1, %v216_v26 }
 0x1c3   :  { %v265_v31 = vpop.f32.mrf.mxu2 }
 0x1c4   :  { %v266_v33 = vadd.f32 %v440_v32, %v265_v31 }
 0x1c6   :  { %450 = vtanh.f32 %v266_v33 }
 0x1cb   :  { %v267_v34 = vpop.f32.mrf.mxu2 }
 0x1cc   :  { %v268_v35 = vadd.f32 %v440_v32, %v267_v34  ;;  %v451_v36 = vpop.eup %450 }
 0x1ce   :  { %452 = vtanh.f32 %v268_v35 }
 0x1d4   :  { %v453_v37 = vpop.eup %452 }
 0x1d5   :  { %v272_v38 = vpack.c.bf16 %v453_v37, %v451_v36 }
 0x1d7   :  { %412 = vmatmul.msk.bf16.vlgmr.msra.gmra.mxu3 %vm196_vm1, %v272_v38 }
 0x25a   :  { %v321_v40 = vpop.f32.mrf.mxu3 }
 0x25b   :  { %v322_v41 = vadd.f32 %v441_v39, %v321_v40 }
 0x25d   :  { %326 = vst [vmem:[#allocation11] sm:$0xff] %v322_v41 }
 0x262   :  { %v323_v42 = vpop.f32.mrf.mxu3 }
 0x263   :  { %v324_v43 = vadd.f32 %v441_v39, %v323_v42 }
 0x265   :  { %327 = vst [vmem:[#allocation11 + $0x8] sm:$0xff] %v324_v43 }
 0x266   :  { %340 = dma.vmem_to_hbm [thread:$0]  %s333_s17, 256, %s335_s19, [#allocation4], %s614_s20, %s614_s20, %s615_s21  }
 0x267   :  { %604 = dma.done.wait [#allocation4], 256  }
 0x268   :  { %605 = vsyncadd [#allocation4], 4294967040 }
 0x269   :  { %345 = vsyncpa [#allocation3], 1 }
 0x26a   :  { %346 = vsyncpa [#allocation6], 1 }
 0x26b   :  { %347 = vsyncpa [#allocation9], 1 }
 0x26c   :  { %348 = vsyncpa [#allocation4], 1 }

</bundles_post_ra>
